<compile_context>
chip_gen: v7x
topology: tpu7x:2x2x1
jax: 0.10.0
libtpu: 0.0.40
codegen_flags: <defaults>
</compile_context>

<pallas_src>
import math

import jax
import jax.numpy as jnp
from jax.experimental import pallas as pl
from jax.experimental.pallas import tpu as pltpu

HID = 64          # hidden width of both fc layers (from the module)
ATOM_PAD = 64     # lane-aligned per-action atom block (>= atom_size, total width % 128 == 0)


def _round_up(x, m):
    return ((x + m - 1) // m) * m


def _ceil_div(a, b):
    return -(-a // b)


# ---------------------------------------------------------------------------
# Kernel
# ---------------------------------------------------------------------------
def estimator_kernel(s_ref, w1_ref, b1_ref, w2_ref, b2_ref, w3_ref, b3_ref,
                     ones_bd_ref, expand_bd_ref, support_bd_ref, q_ref):
    """Fused MLP + per-action softmax + clamp(min=0.001) + expectation."""
    # --- MLP: bf16 MXU operands, f32 accumulation, f32 bias/ReLU ---
    x = s_ref[...].astype(jnp.bfloat16)
    h1 = jnp.dot(x, w1_ref[...], preferred_element_type=jnp.float32) + b1_ref[...]
    h1 = jnp.maximum(h1, 0.0).astype(jnp.bfloat16)
    h2 = jnp.dot(h1, w2_ref[...], preferred_element_type=jnp.float32) + b2_ref[...]
    h2 = jnp.maximum(h2, 0.0).astype(jnp.bfloat16)
    # logits: (bb, A*ATOM_PAD); padded atom columns carry bias -1e30 (zero weights).
    logits = jnp.dot(h2, w3_ref[...], preferred_element_type=jnp.float32) + b3_ref[...]

    # --- per-action softmax via one global row max + block-diag MXU matmuls ---
    # Softmax is shift-invariant per action block, so a single global row max is
    # equivalent to per-block maxes; the denominator guard below protects against
    # a whole action block underflowing to 0 when the cross-action logit spread
    # is extreme (trained RL heads).
    m = jnp.max(logits, axis=-1, keepdims=True)                  # (bb, 1)
    e = jnp.exp(logits - m)                                      # f32; padded atoms -> 0

    # denominator per action: (bb, A*P) @ (A*P, A) block-diag ones, bf16 operands.
    denom = jnp.dot(e.astype(jnp.bfloat16), ones_bd_ref[...],
                    preferred_element_type=jnp.float32)          # (bb, A) f32
    denom = jnp.maximum(denom, 1e-30)                            # NaN guard
    inv = pl.reciprocal(denom, approx=True)                      # EUP slot, ~free
    # broadcast 1/denom back over each per-action lane block via MXU (exact ones).
    inv_full = jnp.dot(inv.astype(jnp.bfloat16), expand_bd_ref[...],
                       preferred_element_type=jnp.float32)       # (bb, A*P) f32

    dist = jnp.maximum(e * inv_full, 0.001)                      # dist.clamp(min=0.001), f32
    # expectation over the support (padded atoms have support 0, so the clamp-0.001
    # they pick up contributes nothing) -> single lane-dense store.
    q_ref[...] = jnp.dot(dist.astype(jnp.bfloat16), support_bd_ref[...],
                         preferred_element_type=jnp.float32)     # (bb, A)


# ---------------------------------------------------------------------------
# Wrapper
# ---------------------------------------------------------------------------
def _pick_tiling(batch, block_b):
    """Choose a batch tile (multiple of 8) minimizing padding waste; split into
    >=2 tiles for batches >=16 so both v7x TensorCores get work."""
    n_tiles = max(_ceil_div(batch, block_b), 1)
    if batch >= 16:
        n_tiles = max(n_tiles, 2)
    bb = _round_up(_ceil_div(batch, n_tiles), 8)
    padded = _round_up(batch, bb)
    return bb, padded


def estimator_forward(s, kparams, consts, *, num_actions, block_b=512):
    """q = EstimatorNetwork(s).  s: (batch, state_dim) f32 -> (batch, num_actions) f32."""
    batch, state_dim = s.shape
    bb, padded = _pick_tiling(batch, block_b)
    if padded != batch:
        s = jnp.pad(s, ((0, padded - batch), (0, 0)))
    grid = (padded // bb,)

    operands = (kparams["w1"], kparams["b1"],
                kparams["w2"], kparams["b2"],
                kparams["w3p"], kparams["b3p"],
                consts["ones_bd"], consts["expand_bd"], consts["support_bd"])

    def full_spec(arr):
        nd = arr.ndim
        return pl.BlockSpec(tuple(arr.shape), lambda i, _nd=nd: (0,) * _nd)

    q = pl.pallas_call(
        estimator_kernel,
        out_shape=jax.ShapeDtypeStruct((padded, num_actions), jnp.float32),
        grid=grid,
        in_specs=[pl.BlockSpec((bb, state_dim), lambda i: (i, 0))]
                 + [full_spec(a) for a in operands],
        out_specs=pl.BlockSpec((bb, num_actions), lambda i: (i, 0)),
        compiler_params=pltpu.CompilerParams(
            dimension_semantics=("parallel",),          # batch tiles shard across TCs on v7x
            vmem_limit_bytes=40 * 1024 * 1024),         # explicit, safe under v7x's 64 MiB
    )(s, *operands)
    return q[:batch]


# ---------------------------------------------------------------------------
# Parameters / constants
# ---------------------------------------------------------------------------
def init_params(key, state_dim, num_actions, atom_size):
    """Deterministic synthetic params (PyTorch-Linear-like uniform init), f32."""
    ks = jax.random.split(key, 6)

    def lin(kw, kb, fan_in, fan_out):
        bound = 1.0 / jnp.sqrt(fan_in)
        w = jax.random.uniform(kw, (fan_in, fan_out), jnp.float32, -bound, bound)
        b = jax.random.uniform(kb, (1, fan_out), jnp.float32, -bound, bound)
        return w, b

    w1, b1 = lin(ks[0], ks[1], state_dim, HID)
    w2, b2 = lin(ks[2], ks[3], HID, HID)
    w3, b3 = lin(ks[4], ks[5], HID, num_actions * atom_size)
    return {"w1": w1, "b1": b1, "w2": w2, "b2": b2, "w3": w3, "b3": b3}


def prepare_kernel_params(params, *, num_actions, atom_size, atom_pad=ATOM_PAD):
    """Lane-align w3/b3 to atom_pad columns per action; cast MXU weights to bf16."""
    A, K, P = num_actions, atom_size, atom_pad
    assert K <= P and (A * P) % 128 == 0
    hid = params["w3"].shape[0]
    w3 = params["w3"].reshape(hid, A, K)
    b3 = params["b3"].reshape(1, A, K)
    w3p = jnp.zeros((hid, A, P), jnp.float32).at[:, :, :K].set(w3).reshape(hid, A * P)
    # padded atoms get bias -1e30 so exp(logit - max) == 0 exactly (f32 logits)
    b3p = jnp.full((1, A, P), -1e30, jnp.float32).at[:, :, :K].set(b3).reshape(1, A * P)
    return {
        "w1": params["w1"].astype(jnp.bfloat16),
        "b1": params["b1"],
        "w2": params["w2"].astype(jnp.bfloat16),
        "b2": params["b2"],
        "w3p": w3p.astype(jnp.bfloat16),
        "b3p": b3p,
    }


def build_constants(support, *, num_actions, atom_size, atom_pad=ATOM_PAD):
    """Block-diagonal bf16 constants for the MXU softmax-denominator / expectation."""
    A, K, P = num_actions, atom_size, atom_pad
    out = A * P
    col_action = jnp.arange(out) // P
    col_atom = jnp.arange(out) % P
    ones_bd = jax.nn.one_hot(col_action, A, dtype=jnp.float32)          # (A*P, A)
    expand_bd = ones_bd.T                                               # (A, A*P)
    sup_vals = jnp.where(col_atom < K, support[jnp.minimum(col_atom, K - 1)], 0.0)
    support_bd = ones_bd * sup_vals[:, None]                            # (A*P, A)
    return {"ones_bd": ones_bd.astype(jnp.bfloat16),
            "expand_bd": expand_bd.astype(jnp.bfloat16),
            "support_bd": support_bd.astype(jnp.bfloat16)}


# ---------------------------------------------------------------------------
# Pure-JAX references
# ---------------------------------------------------------------------------
def reference_forward(s, params, support, *, num_actions, atom_size):
    """Exact f32 mirror of EstimatorNetwork.forward (PyTorch semantics)."""
    h1 = jax.nn.relu(jnp.dot(s, params["w1"]) + params["b1"])
    h2 = jax.nn.relu(jnp.dot(h1, params["w2"]) + params["b2"])
    logits = jnp.dot(h2, params["w3"]) + params["b3"]
    q_atoms = logits.reshape(-1, num_actions, atom_size)
    dist = jax.nn.softmax(q_atoms, axis=-1)
    dist = jnp.maximum(dist, 0.001)                 # dist.clamp(min=0.001)
    return jnp.sum(dist * support.reshape(1, 1, atom_size), axis=2)


def reference_matched(s, params, support, *, num_actions, atom_size):
    """Mirror of the kernel's numeric choices (bf16 MXU operands, global row max,
    bf16 reduction operands, f32 everything else); exact reciprocal."""
    bf = lambda a: a.astype(jnp.bfloat16)
    f32 = lambda a: a.astype(jnp.float32)
    h1 = jnp.maximum(jnp.dot(bf(s), bf(params["w1"]),
                             preferred_element_type=jnp.float32) + params["b1"], 0.0)
    h2 = jnp.maximum(jnp.dot(bf(h1), bf(params["w2"]),
                             preferred_element_type=jnp.float32) + params["b2"], 0.0)
    logits = jnp.dot(bf(h2), bf(params["w3"]),
                     preferred_element_type=jnp.float32) + params["b3"]
    B = logits.shape[0]
    m = jnp.max(logits, axis=-1, keepdims=True)                     # global row max
    e = jnp.exp(logits - m).reshape(B, num_actions, atom_size)      # f32
    denom = jnp.sum(f32(bf(e)), axis=-1, keepdims=True)             # bf16 operands, f32 acc
    inv = f32(bf(1.0 / jnp.maximum(denom, 1e-30)))                  # bf16 broadcast operand
    dist = jnp.maximum(e * inv, 0.001)
    sup_bf = f32(bf(support)).reshape(1, 1, atom_size)
    return jnp.sum(f32(bf(dist)) * sup_bf, axis=-1)


# ---------------------------------------------------------------------------
if __name__ == "__main__":
    # Small shapes consistent with the module: state_shape=[8, 8] -> state_dim=64.
    batch = 4
    state_shape = (8, 8)
    state_dim = int(math.prod(state_shape))
    num_actions = 6
    atom_size = 51
    v_min, v_max = -10.0, 10.0

    key = jax.random.PRNGKey(0)
    k_params, k_state = jax.random.split(key)

    params = init_params(k_params, state_dim, num_actions, atom_size)
    support = jnp.linspace(v_min, v_max, atom_size, dtype=jnp.float32)

    kparams = prepare_kernel_params(params, num_actions=num_actions, atom_size=atom_size)
    consts = build_constants(support, num_actions=num_actions, atom_size=atom_size)

    # The PyTorch forward takes the already-flattened state (batch, prod(state_shape)).
    s = jax.random.normal(k_state, (batch, state_dim), dtype=jnp.float32)

    q = estimator_forward(s, kparams, consts, num_actions=num_actions)
    q = jax.block_until_ready(q)
    assert q.shape == (batch, num_actions)
    assert bool(jnp.all(jnp.isfinite(q)))

    # 1) vs reference mirroring the kernel's precision choices (tight tolerance)
    q_m = reference_matched(s, params, support, num_actions=num_actions, atom_size=atom_size)
    assert jnp.allclose(q, q_m, rtol=5e-3, atol=5e-3), (q, q_m)

    # 2) sanity vs exact-f32 PyTorch-semantics reference (loose tolerance covers
    #    bf16 MXU operands + bf16 reduction operands + approx reciprocal)
    q_f32 = reference_forward(s, params, support, num_actions=num_actions, atom_size=atom_size)
    assert jnp.allclose(q, q_f32, rtol=5e-2, atol=5e-2), (q, q_f32)

    print("KERNEL_OK")
</pallas_src>

<mosaic_0001>
module attributes {stable_mosaic.version = 11 : i64} {
  func.func @estimator_kernel(%arg0: i32, %arg1: memref<8x64xf32, #tpu.memory_space<vmem>>, %arg2: memref<64x64xbf16, #tpu.memory_space<vmem>>, %arg3: memref<1x64xf32, #tpu.memory_space<vmem>>, %arg4: memref<64x64xbf16, #tpu.memory_space<vmem>>, %arg5: memref<1x64xf32, #tpu.memory_space<vmem>>, %arg6: memref<64x384xbf16, #tpu.memory_space<vmem>>, %arg7: memref<1x384xf32, #tpu.memory_space<vmem>>, %arg8: memref<384x6xbf16, #tpu.memory_space<vmem>>, %arg9: memref<6x384xbf16, #tpu.memory_space<vmem>>, %arg10: memref<384x6xbf16, #tpu.memory_space<vmem>>, %arg11: memref<8x6xf32, #tpu.memory_space<vmem>>) attributes {dimension_semantics = [#tpu.dimension_semantics<parallel>], iteration_bounds = array<i64: 1>, scalar_prefetch = 0 : i64, scratch_operands = 0 : i64, tpu.core_type = #tpu.core_type<tc>, window_params = [{transform_indices = @transform_0, window_bounds = array<i64: 8, 64>}, {pipeline_mode = #tpu.pipeline_mode<synchronous>, transform_indices = @transform_1, window_bounds = array<i64: 64, 64>}, {pipeline_mode = #tpu.pipeline_mode<synchronous>, transform_indices = @transform_2, window_bounds = array<i64: 1, 64>}, {pipeline_mode = #tpu.pipeline_mode<synchronous>, transform_indices = @transform_3, window_bounds = array<i64: 64, 64>}, {pipeline_mode = #tpu.pipeline_mode<synchronous>, transform_indices = @transform_4, window_bounds = array<i64: 1, 64>}, {pipeline_mode = #tpu.pipeline_mode<synchronous>, transform_indices = @transform_5, window_bounds = array<i64: 64, 384>}, {pipeline_mode = #tpu.pipeline_mode<synchronous>, transform_indices = @transform_6, window_bounds = array<i64: 1, 384>}, {pipeline_mode = #tpu.pipeline_mode<synchronous>, transform_indices = @transform_7, window_bounds = array<i64: 384, 6>}, {pipeline_mode = #tpu.pipeline_mode<synchronous>, transform_indices = @transform_8, window_bounds = array<i64: 6, 384>}, {pipeline_mode = #tpu.pipeline_mode<synchronous>, transform_indices = @transform_9, window_bounds = array<i64: 384, 6>}, {transform_indices = @transform_10, window_bounds = array<i64: 8, 6>}]} {
    %c0 = arith.constant 0 : index
    %c0_0 = arith.constant 0 : index
    %0 = vector.load %arg1[%c0, %c0_0] : memref<8x64xf32, #tpu.memory_space<vmem>>, vector<8x64xf32>
    %1 = arith.truncf %0 : vector<8x64xf32> to vector<8x64xbf16>
    %c0_1 = arith.constant 0 : index
    %c0_2 = arith.constant 0 : index
    %2 = vector.load %arg2[%c0_1, %c0_2] : memref<64x64xbf16, #tpu.memory_space<vmem>>, vector<64x64xbf16>
    %cst = arith.constant dense<0.000000e+00> : vector<8x64xf32>
    %3 = tpu.matmul %1, %2, %cst {dimension_numbers = #tpu.dot_dimension_numbers<[1], [0], [0], [1], [0, 0, 1, 1], [], []>} : vector<8x64xbf16>, vector<64x64xbf16>, vector<8x64xf32> -> vector<8x64xf32>
    %c0_3 = arith.constant 0 : index
    %c0_4 = arith.constant 0 : index
    %4 = vector.load %arg3[%c0_3, %c0_4] : memref<1x64xf32, #tpu.memory_space<vmem>>, vector<1x64xf32>
    %5 = vector.broadcast %4 : vector<1x64xf32> to vector<8x64xf32>
    %6 = arith.addf %3, %5 : vector<8x64xf32>
    %cst_5 = arith.constant 0.000000e+00 : f32
    %7 = vector.broadcast %cst_5 : f32 to vector<8x64xf32>
    %8 = arith.maximumf %6, %7 : vector<8x64xf32>
    %9 = arith.truncf %8 : vector<8x64xf32> to vector<8x64xbf16>
    %c0_6 = arith.constant 0 : index
    %c0_7 = arith.constant 0 : index
    %10 = vector.load %arg4[%c0_6, %c0_7] : memref<64x64xbf16, #tpu.memory_space<vmem>>, vector<64x64xbf16>
    %cst_8 = arith.constant dense<0.000000e+00> : vector<8x64xf32>
    %11 = tpu.matmul %9, %10, %cst_8 {dimension_numbers = #tpu.dot_dimension_numbers<[1], [0], [0], [1], [0, 0, 1, 1], [], []>} : vector<8x64xbf16>, vector<64x64xbf16>, vector<8x64xf32> -> vector<8x64xf32>
    %c0_9 = arith.constant 0 : index
    %c0_10 = arith.constant 0 : index
    %12 = vector.load %arg5[%c0_9, %c0_10] : memref<1x64xf32, #tpu.memory_space<vmem>>, vector<1x64xf32>
    %13 = vector.broadcast %12 : vector<1x64xf32> to vector<8x64xf32>
    %14 = arith.addf %11, %13 : vector<8x64xf32>
    %cst_11 = arith.constant 0.000000e+00 : f32
    %15 = vector.broadcast %cst_11 : f32 to vector<8x64xf32>
    %16 = arith.maximumf %14, %15 : vector<8x64xf32>
    %17 = arith.truncf %16 : vector<8x64xf32> to vector<8x64xbf16>
    %c0_12 = arith.constant 0 : index
    %c0_13 = arith.constant 0 : index
    %18 = vector.load %arg6[%c0_12, %c0_13] : memref<64x384xbf16, #tpu.memory_space<vmem>>, vector<64x384xbf16>
    %cst_14 = arith.constant dense<0.000000e+00> : vector<8x384xf32>
    %19 = tpu.matmul %17, %18, %cst_14 {dimension_numbers = #tpu.dot_dimension_numbers<[1], [0], [0], [1], [0, 0, 1, 1], [], []>} : vector<8x64xbf16>, vector<64x384xbf16>, vector<8x384xf32> -> vector<8x384xf32>
    %c0_15 = arith.constant 0 : index
    %c0_16 = arith.constant 0 : index
    %20 = vector.load %arg7[%c0_15, %c0_16] : memref<1x384xf32, #tpu.memory_space<vmem>>, vector<1x384xf32>
    %21 = vector.broadcast %20 : vector<1x384xf32> to vector<8x384xf32>
    %22 = arith.addf %19, %21 : vector<8x384xf32>
    %cst_17 = arith.constant dense<0xFF800000> : vector<8xf32>
    %23 = vector.multi_reduction <maximumf>, %22, %cst_17 [1] : vector<8x384xf32> to vector<8xf32>
    %24 = vector.shape_cast %23 : vector<8xf32> to vector<8x1xf32>
    %25 = vector.broadcast %24 : vector<8x1xf32> to vector<8x384xf32>
    %26 = arith.subf %22, %25 : vector<8x384xf32>
    %27 = math.exp %26 : vector<8x384xf32>
    %28 = arith.truncf %27 : vector<8x384xf32> to vector<8x384xbf16>
    %c0_18 = arith.constant 0 : index
    %c0_19 = arith.constant 0 : index
    %29 = vector.load %arg8[%c0_18, %c0_19] : memref<384x6xbf16, #tpu.memory_space<vmem>>, vector<384x6xbf16>
    %cst_20 = arith.constant dense<0.000000e+00> : vector<8x6xf32>
    %30 = tpu.matmul %28, %29, %cst_20 {dimension_numbers = #tpu.dot_dimension_numbers<[1], [0], [0], [1], [0, 0, 1, 1], [], []>} : vector<8x384xbf16>, vector<384x6xbf16>, vector<8x6xf32> -> vector<8x6xf32>
    %cst_21 = arith.constant 1.000000e-30 : f32
    %31 = vector.broadcast %cst_21 : f32 to vector<8x6xf32>
    %32 = arith.maximumf %30, %31 : vector<8x6xf32>
    %33 = tpu.reciprocal %32 {approx = true} : vector<8x6xf32> -> vector<8x6xf32>
    %34 = arith.truncf %33 : vector<8x6xf32> to vector<8x6xbf16>
    %c0_22 = arith.constant 0 : index
    %c0_23 = arith.constant 0 : index
    %35 = vector.load %arg9[%c0_22, %c0_23] : memref<6x384xbf16, #tpu.memory_space<vmem>>, vector<6x384xbf16>
    %cst_24 = arith.constant dense<0.000000e+00> : vector<8x384xf32>
    %36 = tpu.matmul %34, %35, %cst_24 {dimension_numbers = #tpu.dot_dimension_numbers<[1], [0], [0], [1], [0, 0, 1, 1], [], []>} : vector<8x6xbf16>, vector<6x384xbf16>, vector<8x384xf32> -> vector<8x384xf32>
    %37 = arith.mulf %27, %36 : vector<8x384xf32>
    %cst_25 = arith.constant 1.000000e-03 : f32
    %38 = vector.broadcast %cst_25 : f32 to vector<8x384xf32>
    %39 = arith.maximumf %37, %38 : vector<8x384xf32>
    %40 = arith.truncf %39 : vector<8x384xf32> to vector<8x384xbf16>
    %c0_26 = arith.constant 0 : index
    %c0_27 = arith.constant 0 : index
    %41 = vector.load %arg10[%c0_26, %c0_27] : memref<384x6xbf16, #tpu.memory_space<vmem>>, vector<384x6xbf16>
    %cst_28 = arith.constant dense<0.000000e+00> : vector<8x6xf32>
    %42 = tpu.matmul %40, %41, %cst_28 {dimension_numbers = #tpu.dot_dimension_numbers<[1], [0], [0], [1], [0, 0, 1, 1], [], []>} : vector<8x384xbf16>, vector<384x6xbf16>, vector<8x6xf32> -> vector<8x6xf32>
    %c0_29 = arith.constant 0 : index
    %c0_30 = arith.constant 0 : index
    %43 = vector.load %arg11[%c0_29, %c0_30] : memref<8x6xf32, #tpu.memory_space<vmem>>, vector<8x6xf32>
    tpu.vector_store %arg11[%c0_29, %c0_30], %42 {strides = array<i32>} : memref<8x6xf32, #tpu.memory_space<vmem>>, vector<8x6xf32>,
    return
  }
  func.func @transform_0(%arg0: i32) -> (i32, i32) {
    %c0_i32 = arith.constant 0 : i32
    %c0_i32_0 = arith.constant 0 : i32
    return %arg0, %c0_i32 : i32, i32
  }
  func.func @transform_1(%arg0: i32) -> (i32, i32) {
    %c0_i32 = arith.constant 0 : i32
    %c0_i32_0 = arith.constant 0 : i32
    %c0_i32_1 = arith.constant 0 : i32
    return %c0_i32, %c0_i32_0 : i32, i32
  }
  func.func @transform_2(%arg0: i32) -> (i32, i32) {
    %c0_i32 = arith.constant 0 : i32
    %c0_i32_0 = arith.constant 0 : i32
    %c0_i32_1 = arith.constant 0 : i32
    return %c0_i32, %c0_i32_0 : i32, i32
  }
  func.func @transform_3(%arg0: i32) -> (i32, i32) {
    %c0_i32 = arith.constant 0 : i32
    %c0_i32_0 = arith.constant 0 : i32
    %c0_i32_1 = arith.constant 0 : i32
    return %c0_i32, %c0_i32_0 : i32, i32
  }
  func.func @transform_4(%arg0: i32) -> (i32, i32) {
    %c0_i32 = arith.constant 0 : i32
    %c0_i32_0 = arith.constant 0 : i32
    %c0_i32_1 = arith.constant 0 : i32
    return %c0_i32, %c0_i32_0 : i32, i32
  }
  func.func @transform_5(%arg0: i32) -> (i32, i32) {
    %c0_i32 = arith.constant 0 : i32
    %c0_i32_0 = arith.constant 0 : i32
    %c0_i32_1 = arith.constant 0 : i32
    return %c0_i32, %c0_i32_0 : i32, i32
  }
  func.func @transform_6(%arg0: i32) -> (i32, i32) {
    %c0_i32 = arith.constant 0 : i32
    %c0_i32_0 = arith.constant 0 : i32
    %c0_i32_1 = arith.constant 0 : i32
    return %c0_i32, %c0_i32_0 : i32, i32
  }
  func.func @transform_7(%arg0: i32) -> (i32, i32) {
    %c0_i32 = arith.constant 0 : i32
    %c0_i32_0 = arith.constant 0 : i32
    %c0_i32_1 = arith.constant 0 : i32
    return %c0_i32, %c0_i32_0 : i32, i32
  }
  func.func @transform_8(%arg0: i32) -> (i32, i32) {
    %c0_i32 = arith.constant 0 : i32
    %c0_i32_0 = arith.constant 0 : i32
    %c0_i32_1 = arith.constant 0 : i32
    return %c0_i32, %c0_i32_0 : i32, i32
  }
  func.func @transform_9(%arg0: i32) -> (i32, i32) {
    %c0_i32 = arith.constant 0 : i32
    %c0_i32_0 = arith.constant 0 : i32
    %c0_i32_1 = arith.constant 0 : i32
    return %c0_i32, %c0_i32_0 : i32, i32
  }
  func.func @transform_10(%arg0: i32) -> (i32, i32) {
    %c0_i32 = arith.constant 0 : i32
    %c0_i32_0 = arith.constant 0 : i32
    return %arg0, %c0_i32 : i32, i32
  }
}

</mosaic_0001>

<bundles_post_ra>
// kernel: tpu_custom_call.1
= control target key start
LH: loop header
LB: loop body
LE: loop exit
PB: predicated region body
PF: predicated region fallthrough
CT: control target
= control target key end

     0   :  { %v1433_v1 = vmov 0.0   ;;  %vm1434_vm0 = vmmov 0   ;;  %vm78_vm1 = vcmask 523264   ;;  %s1791_s0 = inlined_call_operand.vmem [shape: f32[8,64], index: 0, kind: input, shape index: {}]   ;;  %s1792_s1 = inlined_call_operand.vmem [shape: bf16[64,64], index: 1, kind: input, shape index: {}]   ;;  %s1793_s2 = inlined_call_operand.vmem [shape: f32[1,64], index: 2, kind: input, shape index: {}]   ;;  %s1794_s3 = inlined_call_operand.vmem [shape: bf16[64,64], index: 3, kind: input, shape index: {}]   ;;  %s1795_s4 = inlined_call_operand.vmem [shape: f32[1,64], index: 4, kind: input, shape index: {}]   ;;  %s1796_s5 = inlined_call_operand.vmem [shape: bf16[64,384], index: 5, kind: input, shape index: {}]   ;;  %s1797_s6 = inlined_call_operand.vmem [shape: f32[1,384], index: 6, kind: input, shape index: {}]   ;;  %s1798_s7 = inlined_call_operand.vmem [shape: bf16[384,6], index: 7, kind: input, shape index: {}]   ;;  %s1799_s8 = inlined_call_operand.vmem [shape: bf16[6,384], index: 8, kind: input, shape index: {}]   ;;  %s1800_s9 = inlined_call_operand.vmem [shape: bf16[384,6], index: 9, kind: input, shape index: {}]   ;;  %s1801_s10 = inlined_call_operand.hbm [shape: f32[8,6], index: 10, kind: output, shape index: {}]  }
   0x1   :  { %v1326_v0 = vld [vmem:[%s1792_s1] sm:$0xff]   ;;  %1240 = vmatprep.subr.bf16.mxu0 %v1433_v1  ;;  %1252 = vmatprep.subr.bf16.mxu1 %v1433_v1  ;;  %v1327_v2 = vld [vmem:[%s1792_s1 + $0x8] sm:$0xff]   ;;  %v1328_v4 = vld [vmem:[%s1792_s1 + $0x10] sm:$0xff]  }
   0x2   :  { %1241 = vmatpush3.bf16.msra.mxu0 %v1326_v0  ;;  %1248 = vmatprep.mubr.msk.bf16.mxu0 %vm1434_vm0, %v1433_v1  ;;  %v1330_v3 = vld [vmem:[%s1794_s3] sm:$0xff]   ;;  %v1331_v5 = vld [vmem:[%s1794_s3 + $0x8] sm:$0xff]   ;;  %v1329_v6 = vld [vmem:[%s1792_s1 + $0x18] sm:$0xff]  }
   0x3   :  { %1242 = vmatprep.subr.bf16.mxu0 %v1433_v1  ;;  %1260 = vmatprep.mubr.msk.bf16.mxu1 %vm1434_vm0, %v1433_v1  ;;  %v37_v7 = vld [vmem:[%s1791_s0] sm:$0xff] }
   0x4   :  { %1253 = vmatpush3.bf16.msra.mxu1 %v1330_v3  ;;  %v38_v8 = vpack.c.bf16 %v37_v7, %v37_v7 }
   0x5   :  { %1254 = vmatprep.subr.bf16.mxu1 %v1433_v1 }
   0x6   :  { %1243 = vmatpush3.bf16.msra.mxu0 %v1327_v2 }
   0x7   :  { %1244 = vmatprep.subr.bf16.mxu0 %v1433_v1 }
   0x8   :  { %1255 = vmatpush3.bf16.msra.mxu1 %v1331_v5 }
   0x9   :  { %1256 = vmatprep.subr.bf16.mxu1 %v1433_v1 }
   0xa   :  { %1245 = vmatpush3.bf16.msra.mxu0 %v1328_v4 }
   0xb   :  { %1246 = vmatprep.subr.bf16.mxu0 %v1433_v1 }
   0xe   :  { %1247 = vmatpush3.bf16.msra.mxu0 %v1329_v6 }
  0x11   :  { %1249 = vmatmul.mubr.msk.bf16.vlgmr.msra.gmra.mrb[0].mxu0 %vm78_vm1, %v38_v8 }
  0x12   :  { %15 = vsyncpa [#allocation3], 0  ;;  %v1332_v9 = vld [vmem:[%s1794_s3 + $0x10] sm:$0xff]   ;;  %v1333_v10 = vld [vmem:[%s1794_s3 + $0x18] sm:$0xff]   ;;  %v1435_v31 = vmov 0   ;;  %v226_v51 = vlaneseq  ;;  %vm694_vm2 = vcmask 1042432  }
  0x13   :  { %1257 = vmatpush3.bf16.msra.mxu1 %v1332_v9  ;;  %v1334_v11 = vld [vmem:[%s1796_s5] ss:$12 sps:$4 sm:$0xff]   ;;  %v1336_v12 = vld [vmem:[%s1796_s5 + $0x4] ss:$12 sps:$4 sm:$0xff]   ;;  %v1340_v13 = vld [vmem:[%s1796_s5 + $0x1c] ss:$12 sps:$4 sm:$0xff]   ;;  %340 = vmatprep.mubr.bf16.mxu0 %v1435_v31 }
  0x14   :  { %1258 = vmatprep.subr.bf16.mxu1 %v1433_v1  ;;  %308 = vmatprep.subr.bf16.mxu0 %v1336_v12  ;;  %v1338_v14 = vld [vmem:[%s1796_s5 + $0x18] ss:$12 sps:$4 sm:$0xff]   ;;  %v1344_v15 = vld [vmem:[%s1796_s5 + $0x34] ss:$12 sps:$4 sm:$0xff]   ;;  %v1342_v16 = vld [vmem:[%s1796_s5 + $0x30] ss:$12 sps:$4 sm:$0xff]  }
  0x15   :  { %309 = vmatpush1.bf16.msra.mxu0 %v1334_v11  ;;  %v1081_v17 = vld [vmem:[%s1793_s2] ss:$0 sm:$0xff]  ;;  %v1337_v24 = vld [vmem:[%s1796_s5 + $0x8] ss:$12 sps:$4 sm:$0xff]   ;;  %v1345_v27 = vld [vmem:[%s1796_s5 + $0x38] ss:$12 sps:$4 sm:$0xff]  }
  0x16   :  { %310 = vmatprep.subr.bf16.mxu0 %v1340_v13  ;;  %v1341_v26 = vld [vmem:[%s1796_s5 + $0x20] ss:$12 sps:$4 sm:$0xff]   ;;  %v1346_v29 = vld [vmem:[%s1796_s5 + $0x48] ss:$12 sps:$4 sm:$0xff]   ;;  %v1349_v30 = vld [vmem:[%s1796_s5 + $0x50] ss:$12 sps:$4 sm:$0xff]  }
  0x17   :  { %1259 = vmatpush3.bf16.msra.mxu1 %v1333_v10  ;;  %v1348_v28 = vld [vmem:[%s1796_s5 + $0x4c] ss:$12 sps:$4 sm:$0xff]   ;;  %v1087_v32 = vld [vmem:[%s1795_s4] ss:$0 sm:$0xff]  ;;  %v1356_v46 = vld [vmem:[%s1798_s7 + $0x50] sm:$0xff]   ;;  %v227_v52 = vshrl.u32 %v226_v51, 7 }
  0x18   :  { %1264 = vmatprep.subr.bf16.mxu1 %v1433_v1  ;;  %v1350_v40 = vld [vmem:[%s1798_s7 + $0x40] sm:$0xff]   ;;  %v1353_v43 = vld [vmem:[%s1798_s7 + $0x48] sm:$0xff]   ;;  %v1357_v47 = vld [vmem:[%s1798_s7 + $0x90] sm:$0xff]   ;;  %vm690_vm3 = vcmask 48128  }
  0x19   :  { %311 = vmatpush1.bf16.msra.mxu0 %v1338_v14  ;;  %v1351_v41 = vld [vmem:[%s1798_s7 + $0x80] sm:$0xff]   ;;  %v1354_v44 = vld [vmem:[%s1798_s7 + $0x88] sm:$0xff]   ;;  %v1358_v48 = vld [vmem:[%s1798_s7 + $0x10] sm:$0xff]   ;;  %v228_v53 = vsub.s32 0, %v227_v52  ;;  %v232_v55 = vsub.s32 1, %v227_v52  ;;  %v236_v56 = vsub.s32 2, %v227_v52 }
  0x1a   :  { %312 = vmatprep.subr.bf16.mxu0 %v1344_v15  ;;  %v1352_v42 = vld [vmem:[%s1798_s7] sm:$0xff]   ;;  %v1355_v45 = vld [vmem:[%s1798_s7 + $0x8] sm:$0xff]   ;;  %v1359_v49 = vld [vmem:[%s1798_s7 + $0x58] sm:$0xff]  }
  0x1b   :  { %v1360_v50 = vld [vmem:[%s1798_s7 + $0x98] sm:$0xff]   ;;  %v224_v54 = vld [vmem:[%s1797_s6] sm:$0x7]  ;;  %v1365_v14 = vld [vmem:[%s1798_s7 + $0x68] sm:$0xff]  }
  0x1c   :  { %v229_v57 = vrot.slane %v224_v54, %v228_v53  ;;  %v233_v58 = vrot.slane %v224_v54, %v232_v55  ;;  %v237_v60 = vrot.slane %v224_v54, %v236_v56  ;;  %v1361_v10 = vld [vmem:[%s1798_s7 + $0x18] sm:$0xff]   ;;  %v1362_v11 = vld [vmem:[%s1798_s7 + $0x60] sm:$0xff]   ;;  %v1366_v15 = vld [vmem:[%s1798_s7 + $0xa8] sm:$0xff]  }
  0x1d   :  { %313 = vmatpush1.bf16.msra.mxu0 %v1342_v16  ;;  %v1363_v12 = vld [vmem:[%s1798_s7 + $0xa0] sm:$0xff]   ;;  %v1367_v16 = vld [vmem:[%s1798_s7 + $0x28] sm:$0xff]  }
  0x1e   :  { %314 = vmatprep.subr.bf16.mxu0 %v1348_v28  ;;  %v1364_v13 = vld [vmem:[%s1798_s7 + $0x20] sm:$0xff]  }
  0x1f   :  { %v1377_v55 = vld [vmem:[%s1800_s9 + $0x80] sm:$0xff]  }
  0x20   :  { %v1379_v56 = vld [vmem:[%s1800_s9] sm:$0xff]  }
  0x21   :  { %315 = vmatpush1.bf16.msra.mxu0 %v1346_v29 }
  0x22   :  { %1176 = vmatprep.subr.bf16.mxu0 %v1350_v40  ;;  %v1376_v40 = vld [vmem:[%s1799_s8 + $0x8] ss:$0 sps:$4 sm:$0x77]  }
  0xe4   :  { %v116_v18 = vpop.f32.mrb[0].mxu0 }
  0xe5   :  { %v117_v19 = vadd.f32 %v1081_v17, %v116_v18  ;;  %v1250_v20 = vpop.f32.mrb[1].mxu0  ;;  %v1368_v17 = vld [vmem:[%s1798_s7 + $0x70] sm:$0xff]  }
  0xe6   :  { %v119_v21 = vpop.f32.mrb[2].mxu0  ;;  %v1369_v18 = vld [vmem:[%s1798_s7 + $0xb0] sm:$0xff]   ;;  %v1371_v20 = vld [vmem:[%s1798_s7 + $0x78] sm:$0xff]  }
  0xe7   :  { %v122_v22 = vmax.f32 %v117_v19, 0.0  ;;  %v1251_v23 = vpop.f32.mrb[3].mxu0  ;;  %v1370_v19 = vld [vmem:[%s1798_s7 + $0x30] sm:$0xff]   ;;  %v1372_v21 = vld [vmem:[%s1798_s7 + $0xb8] sm:$0xff]  }
  0xe9   :  { %v123_v25 = vpack.c.bf16 %v122_v22, %v122_v22  ;;  %v1373_v22 = vld [vmem:[%s1798_s7 + $0x38] sm:$0xff]  }
  0xeb   :  { %1261 = vmatmul.mubr.msk.bf16.vlgmr.msra.gmra.mrb[0].mxu1 %vm78_vm1, %v123_v25 }
  0xec   :  { %1265 = vmatpush3.bf16.msra.mxu1 %v1337_v24  ;;  %1272 = vmatprep.mubr.msk.bf16.mxu1 %vm1434_vm0, %v1433_v1 }
  0xed   :  { %1266 = vmatprep.subr.bf16.mxu1 %v1433_v1 }
  0xf0   :  { %1267 = vmatpush3.bf16.msra.mxu1 %v1341_v26 }
  0xf1   :  { %1268 = vmatprep.subr.bf16.mxu1 %v1433_v1 }
  0xf4   :  { %1269 = vmatpush3.bf16.msra.mxu1 %v1345_v27 }
  0xf5   :  { %1270 = vmatprep.subr.bf16.mxu1 %v1433_v1 }
  0xf8   :  { %1271 = vmatpush3.bf16.msra.mxu1 %v1349_v30 }
  0xf9   :  { %1276 = vmatprep.subr.bf16.mxu1 %v1433_v1 }
 0x1be   :  { %v200_v33 = vpop.f32.mrb[0].mxu1 }
 0x1bf   :  { %v201_v34 = vadd.f32 %v1087_v32, %v200_v33  ;;  %v1262_v35 = vpop.f32.mrb[1].mxu1 }
 0x1c0   :  { %v203_v36 = vpop.f32.mrb[2].mxu1 }
 0x1c1   :  { %v206_v37 = vmax.f32 %v201_v34, 0.0  ;;  %v1263_v38 = vpop.f32.mrb[3].mxu1 }
 0x1c3   :  { %v207_v39 = vpack.c.bf16 %v206_v37, %v206_v37  ;;  %v680_v37 = vld [vmem:[%s1799_s8] sm:$0x77] }
 0x1c4   :  { %v1132_v38 = vcombine.high %v680_v37, %v680_v37 }
 0x1c5   :  { %1105 = vmatmul.mubr.msk.bf16.vlgmr.msra.gmra.mrb[4].mxu0 %vm78_vm1, %v207_v39  ;;  %1273 = vmatmul.mubr.msk.bf16.vlgmr.msra.gmra.mrb[4].mxu1 %vm78_vm1, %v207_v39  ;;  %v1131_v39 = vcombine.low %v680_v37, %v680_v37 }
 0x1c6   :  { %1292 = vmatprep.mubr.msk.bf16.mxu1 %vm1434_vm0, %v1433_v1  ;;  %1277 = vmatpush3.bf16.msra.mxu1 %v1351_v41 }
 0x1c7   :  { %1177 = vmatpush3.bf16.msra.mxu0 %v1352_v42  ;;  %1278 = vmatprep.subr.bf16.mxu1 %v1433_v1  ;;  %v696_v41 = vsel %vm694_vm2, %v1131_v39, 0  ;;  %v702_v42 = vsel %vm694_vm2, %v1376_v40, 0 }
 0x1c8   :  { %1178 = vmatprep.subr.bf16.mxu0 %v1353_v43 }
 0x1ca   :  { %1279 = vmatpush3.bf16.msra.mxu1 %v1354_v44 }
 0x1cb   :  { %1179 = vmatpush3.bf16.msra.mxu0 %v1355_v45  ;;  %1280 = vmatprep.subr.bf16.mxu1 %v1433_v1 }
 0x1cc   :  { %1180 = vmatprep.subr.bf16.mxu0 %v1356_v46 }
 0x1ce   :  { %1281 = vmatpush3.bf16.msra.mxu1 %v1357_v47 }
 0x1cf   :  { %1181 = vmatpush3.bf16.msra.mxu0 %v1358_v48  ;;  %1282 = vmatprep.subr.bf16.mxu1 %v1433_v1 }
 0x1d0   :  { %1182 = vmatprep.subr.bf16.mxu0 %v1359_v49 }
 0x1d2   :  { %1283 = vmatpush3.bf16.msra.mxu1 %v1360_v50 }
 0x1d3   :  { %1284 = vmatprep.subr.bf16.mxu1 %v1433_v1  ;;  %1183 = vmatpush3.bf16.msra.mxu0 %v1361_v10  ;;  %v1395_v10 = vld [vmem:[%s1800_s9 + $0xb0] sm:$0xff]  }
 0x1d4   :  { %1184 = vmatprep.subr.bf16.mxu0 %v1362_v11  ;;  %v1396_v11 = vld [vmem:[%s1800_s9 + $0x70] sm:$0xff]  }
 0x1d6   :  { %1285 = vmatpush3.bf16.msra.mxu1 %v1363_v12  ;;  %v1397_v12 = vld [vmem:[%s1800_s9 + $0x30] sm:$0xff]  }
 0x1d7   :  { %1185 = vmatpush3.bf16.msra.mxu0 %v1364_v13  ;;  %1286 = vmatprep.subr.bf16.mxu1 %v1433_v1  ;;  %v1398_v13 = vld [vmem:[%s1800_s9 + $0xb8] sm:$0xff]  }
 0x1d8   :  { %1186 = vmatprep.subr.bf16.mxu0 %v1365_v14  ;;  %v1399_v14 = vld [vmem:[%s1800_s9 + $0x78] sm:$0xff]  }
 0x1da   :  { %1287 = vmatpush3.bf16.msra.mxu1 %v1366_v15  ;;  %v1400_v15 = vld [vmem:[%s1800_s9 + $0x38] sm:$0xff]  }
 0x1db   :  { %1187 = vmatpush3.bf16.msra.mxu0 %v1367_v16  ;;  %1288 = vmatprep.subr.bf16.mxu1 %v1433_v1 }
 0x1dc   :  { %1188 = vmatprep.subr.bf16.mxu0 %v1368_v17 }
 0x1de   :  { %1289 = vmatpush3.bf16.msra.mxu1 %v1369_v18 }
 0x1df   :  { %1189 = vmatpush3.bf16.msra.mxu0 %v1370_v19  ;;  %1290 = vmatprep.subr.bf16.mxu1 %v1433_v1 }
 0x1e0   :  { %1190 = vmatprep.subr.bf16.mxu0 %v1371_v20 }
 0x1e2   :  { %1291 = vmatpush3.bf16.msra.mxu1 %v1372_v21 }
 0x1e3   :  { %1191 = vmatpush3.bf16.msra.mxu0 %v1373_v22  ;;  %1296 = vmatprep.subr.bf16.mxu1 %v1433_v1 }
 0x1e4   :  { %1134 = vmatprep.subr.msk.bf16.mxu0 %vm694_vm2, %v1132_v38 }
 0x298   :  { %v342_v59 = vpop.f32.mrb[4].mxu0  ;;  %v383_v61 = vpop.f32.mrb[4].mxu1 }
 0x299   :  { %v343_v62 = vadd.f32 %v342_v59, %v229_v57  ;;  %v344_v63 = vpop.f32.mrb[5].mxu0  ;;  %v1274_v0 = vpop.f32.mrb[5].mxu1  ;;  %v384_v7 = vadd.f32 %v383_v61, %v237_v60  ;;  %v1380_v59 = vld [vmem:[%s1800_s9 + $0x88] sm:$0xff]   ;;  %v1384_v61 = vld [vmem:[%s1800_s9 + $0x50] sm:$0xff]  }
 0x29a   :  { %v345_v2 = vadd.f32 %v344_v63, %v233_v58  ;;  %v346_v3 = vpop.f32.mrb[6].mxu0  ;;  %v386_v4 = vpop.f32.mrb[6].mxu1  ;;  %v1381_v58 = vld [vmem:[%s1800_s9 + $0x48] sm:$0xff]   ;;  %v1385_v63 = vld [vmem:[%s1800_s9 + $0x10] sm:$0xff]   ;;  %v1387_v0 = vld [vmem:[%s1800_s9 + $0x58] sm:$0xff]  }
 0x29b   :  { %v347_v5 = vpop.f32.mrb[7].mxu0  ;;  %v1275_v6 = vpop.f32.mrb[7].mxu1  ;;  %v1382_v60 = vld [vmem:[%s1800_s9 + $0x8] sm:$0xff]   ;;  %v1388_v3 = vld [vmem:[%s1800_s9 + $0x18] sm:$0xff]   ;;  %v1390_v4 = vld [vmem:[%s1800_s9 + $0x60] sm:$0xff]  }
 0x29c   :  { %v389_v8 = vmax.f32 %v343_v62, %v345_v2  ;;  %v1389_v5 = vld [vmem:[%s1800_s9 + $0xa0] sm:$0xff]  }
 0x29d   :  { %v1391_v6 = vld [vmem:[%s1800_s9 + $0x20] sm:$0xff]  }
 0x29e   :  { %v390_v9 = vmax.f32 %v389_v8, %v384_v7  ;;  %v1392_v8 = vld [vmem:[%s1800_s9 + $0xa8] sm:$0xff]  }
 0x2a0   :  { %391 = vmax.xlane.f32.xlu0 %v390_v9  ;;  %v1394_v9 = vld [vmem:[%s1800_s9 + $0x28] sm:$0xff]  }
 0x32d   :  { %v392_v23 = vpop.xlane.xlu0 %391 }
 0x32e   :  { %v393_v24 = vsub.f32 %v343_v62, %v392_v23  ;;  %v394_v25 = vsub.f32 %v345_v2, %v392_v23  ;;  %v395_v26 = vsub.f32 %v384_v7, %v392_v23  ;;  %v1383_v62 = vld [vmem:[%s1800_s9 + $0x90] sm:$0xff]   ;;  %v1386_v2 = vld [vmem:[%s1800_s9 + $0x98] sm:$0xff]   ;;  %v1393_v7 = vld [vmem:[%s1800_s9 + $0x68] sm:$0xff]  }
 0x330   :  { %v396_v27 = vmul.f32 1.442695, %v393_v24  ;;  %v398_v28 = vmul.f32 1.442695, %v394_v25  ;;  %v400_v29 = vmul.f32 1.442695, %v395_v26 }
 0x332   :  { %1401 = vpow2.f32 %v396_v27 }
 0x333   :  { %1403 = vpow2.f32 %v398_v28 }
 0x334   :  { %1405 = vpow2.f32 %v400_v29 }
 0x33c   :  { %v1670_v30 = vpop.eup %1401 }
 0x33d   :  { %v1672_v32 = vpop.eup %1403  ;;  %v402_v33 = vpack.c.bf16 %v1670_v30, %v1670_v30 }
 0x33e   :  { %v1676_v34 = vpop.eup %1405  ;;  %v403_v35 = vpack.c.bf16 %v1672_v32, %v1672_v32 }
 0x33f   :  { %v404_v36 = vpack.c.bf16 %v1676_v34, %v1676_v34 }
 0x340   :  { %629 = vmatprep.mubr.bf16.mxu0 %v403_v35 }
 0x341   :  { %1293 = vmatmul.mubr.bf16.vlgmr.msra.gmra.mrb[8].mxu1 %v404_v36  ;;  %630 = vmatmul.mubr.bf16.vlgmr.msra.gmra.mrb[8].mxu0 %v402_v33 }
 0x342   :  { %736 = vmatprep.mubr.bf16.mxu0 %v1435_v31  ;;  %1298 = vmatprep.mubr.msk.bf16.mxu1 %vm1434_vm0, %v1433_v1  ;;  %v1378_v31 = vld [vmem:[%s1800_s9 + $0x40] sm:$0xff]   ;;  %s1436_s9 = smov [#allocation2]  }
 0x343   :  { %705 = vmatpush1.bf16.msra.mxu0 %v696_v41  ;;  %1297 = vmatpush3.bf16.msra.mxu1 %v702_v42  ;;  %s1073_s26 = sshll.u32 %s1436_s9, 4  ;;  %s1074_s26 = int_to_ptr.vmem [resolvable:$true] %s1073_s26 }
 0x344   :  { %1302 = vmatprep.subr.bf16.mxu1 %v1433_v1  ;;  %1209 = vmatprep.subr.bf16.mxu0 %v1378_v31  ;;  %s1409_s27 = scalar_lea.vmem %s1074_s26, 128  ;;  %p1414_p1 = scmp.lt.s32.totalorder %s1074_s26, %s1074_s26 }
 0x345   :  { %p1410_p0 = scmp.ne.s32.totalorder %s1074_s26, %s1409_s27  ;;  %p1415_p2 = scmp.lt.s32.totalorder %s1409_s27, %s1409_s27 }
 0x347   :  { %p1416_p3 = por %p1415_p2, %p1414_p1 }
 0x349   :  { %p1417_p4 = pnand %p1416_p3, %p1410_p0 }
 0x414   :  { %v671_v43 = vpop.f32.mrb[8].mxu1  ;;  %v1192_v44 = vpop.f32.mrb[8].mxu0 }
 0x415   :  { %v1294_v45 = vpop.f32.mrb[9].mxu1  ;;  %v1193_v46 = vpop.f32.mrb[9].mxu0 }
 0x416   :  { %v1194_v47 = vadd.f32 %v1193_v46, %v1192_v44  ;;  %v674_v48 = vpop.f32.mrb[10].mxu1  ;;  %v1195_v49 = vpop.f32.mrb[10].mxu0 }
 0x417   :  { %v1295_v50 = vpop.f32.mrb[11].mxu1  ;;  %v1196_v51 = vpop.f32.mrb[11].mxu0 }
 0x418   :  { %v672_v52 = vadd.f32 %v1194_v47, %v671_v43 }
 0x41a   :  { %v677_v53 = vmax.f32 %v672_v52, 1e-30 }
 0x41c   :  { %1407 = vrcp.f32 %v677_v53 }
 0x426   :  { %v1408_v54 = vpop.eup %1407 }
 0x427   :  { %v679_v57 = vpack.c.bf16 %v1408_v54, %v1408_v54 }
 0x429   :  { %1135 = vmatmul.mubr.msk.bf16.vlgmr.msra.gmra.mrb[12].mxu0 %vm690_vm3, %v679_v57  ;;  %1299 = vmatmul.mubr.msk.bf16.vlgmr.msra.gmra.mrb[12].mxu1 %vm690_vm3, %v679_v57 }
 0x42a   :  { %1303 = vmatpush3.bf16.msra.mxu1 %v1377_v55  ;;  %1210 = vmatpush3.bf16.msra.mxu0 %v1379_v56 }
 0x42b   :  { %1304 = vmatprep.subr.bf16.mxu1 %v1433_v1  ;;  %1211 = vmatprep.subr.bf16.mxu0 %v1381_v58 }
 0x42c   :  { %1318 = vmatprep.mubr.msk.bf16.mxu1 %vm1434_vm0, %v1433_v1 }
 0x42e   :  { %1305 = vmatpush3.bf16.msra.mxu1 %v1380_v59  ;;  %1212 = vmatpush3.bf16.msra.mxu0 %v1382_v60 }
 0x42f   :  { %1306 = vmatprep.subr.bf16.mxu1 %v1433_v1  ;;  %1213 = vmatprep.subr.bf16.mxu0 %v1384_v61 }
 0x432   :  { %1307 = vmatpush3.bf16.msra.mxu1 %v1383_v62  ;;  %1214 = vmatpush3.bf16.msra.mxu0 %v1385_v63 }
 0x433   :  { %1308 = vmatprep.subr.bf16.mxu1 %v1433_v1  ;;  %1215 = vmatprep.subr.bf16.mxu0 %v1387_v0 }
 0x436   :  { %1309 = vmatpush3.bf16.msra.mxu1 %v1386_v2  ;;  %1216 = vmatpush3.bf16.msra.mxu0 %v1388_v3 }
 0x437   :  { %1310 = vmatprep.subr.bf16.mxu1 %v1433_v1  ;;  %1217 = vmatprep.subr.bf16.mxu0 %v1390_v4 }
 0x43a   :  { %1311 = vmatpush3.bf16.msra.mxu1 %v1389_v5  ;;  %1218 = vmatpush3.bf16.msra.mxu0 %v1391_v6 }
 0x43b   :  { %1312 = vmatprep.subr.bf16.mxu1 %v1433_v1  ;;  %1219 = vmatprep.subr.bf16.mxu0 %v1393_v7 }
 0x43e   :  { %1313 = vmatpush3.bf16.msra.mxu1 %v1392_v8  ;;  %1220 = vmatpush3.bf16.msra.mxu0 %v1394_v9 }
 0x43f   :  { %1314 = vmatprep.subr.bf16.mxu1 %v1433_v1  ;;  %1221 = vmatprep.subr.bf16.mxu0 %v1396_v11 }
 0x442   :  { %1315 = vmatpush3.bf16.msra.mxu1 %v1395_v10  ;;  %1222 = vmatpush3.bf16.msra.mxu0 %v1397_v12 }
 0x443   :  { %1316 = vmatprep.subr.bf16.mxu1 %v1433_v1  ;;  %1223 = vmatprep.subr.bf16.mxu0 %v1399_v14 }
 0x446   :  { %1317 = vmatpush3.bf16.msra.mxu1 %v1398_v13  ;;  %1224 = vmatpush3.bf16.msra.mxu0 %v1400_v15 }
 0x4fc   :  { %v738_v16 = vpop.f32.mrb[12].mxu0  ;;  %v779_v17 = vpop.f32.mrb[12].mxu1 }
 0x4fd   :  { %v785_v1 = vmul.f32 %v1670_v30, %v738_v16  ;;  %v787_v18 = vmul.f32 %v1676_v34, %v779_v17  ;;  %v740_v19 = vpop.f32.mrb[13].mxu0  ;;  %v1300_v20 = vpop.f32.mrb[13].mxu1 }
 0x4fe   :  { %v786_v21 = vmul.f32 %v1672_v32, %v740_v19  ;;  %v742_v22 = vpop.f32.mrb[14].mxu0  ;;  %v782_v23 = vpop.f32.mrb[14].mxu1 }
 0x4ff   :  { %v788_v24 = vmax.f32 %v785_v1, 0.001  ;;  %v790_v25 = vmax.f32 %v787_v18, 0.001  ;;  %v743_v26 = vpop.f32.mrb[15].mxu0  ;;  %v1301_v27 = vpop.f32.mrb[15].mxu1 }
 0x500   :  { %v789_v28 = vmax.f32 %v786_v21, 0.001 }
 0x501   :  { %v793_v29 = vpack.c.bf16 %v790_v25, %v790_v25  ;;  %v791_v35 = vpack.c.bf16 %v788_v24, %v788_v24 }
 0x502   :  { %v792_v33 = vpack.c.bf16 %v789_v28, %v789_v28 }
 0x503   :  { %1319 = vmatmul.mubr.bf16.vlgmr.msra.gmra.mrb[16].mxu1 %v793_v29 }
 0x504   :  { %1018 = vmatprep.mubr.bf16.mxu0 %v792_v33 }
 0x505   :  { %1019 = vmatmul.mubr.bf16.vlgmr.msra.gmra.mrb[16].mxu0 %v791_v35 }
 0x5d6   :  { %v1060_v30 = vpop.f32.mrb[16].mxu1 }
 0x5d7   :  { %v1320_v36 = vpop.f32.mrb[17].mxu1 }
 0x5d8   :  { %v1225_v34 = vpop.f32.mrb[16].mxu0  ;;  %v1063_v37 = vpop.f32.mrb[18].mxu1 }
 0x5d9   :  { %v1226_v38 = vpop.f32.mrb[17].mxu0  ;;  %v1321_v39 = vpop.f32.mrb[19].mxu1 }
 0x5da   :  { %v1227_v32 = vadd.f32 %v1226_v38, %v1225_v34  ;;  %v1228_v40 = vpop.f32.mrb[18].mxu0 }
 0x5db   :  { %v1229_v41 = vpop.f32.mrb[19].mxu0 }
 0x5dc   :  { %v1061_v42 = vadd.f32 %v1227_v32, %v1060_v30 }
 0x5de   :  { %1066 = vst.msk [vmem:[#allocation2] sm:$0xff] %vm690_vm3, %v1061_v42 }
 0x5df   :  { %1420 = shalt.err (!%p1417_p4)
}
 0x5e0   :  { %s1421_s28 = scalar_lea.hbm %s1801_s10, 128 }
 0x5e1   :  { %p1422_p5 = scmp.ne.s32.totalorder %s1801_s10, %s1421_s28  ;;  %p1425_p6 = scmp.lt.u32.totalorder %s1421_s28, %s1801_s10 }
 0x5e3   :  { %p1427_p7 = pnand %p1425_p6, %p1422_p5 }
 0x5e5   :  { %1430 = shalt.err (!%p1427_p7)
}
 0x5e6   :  { %1076 = dma.vmem_to_hbm [thread:$0]  %s1074_s26, 128, %s1801_s10, [#allocation3]  }
 0x5e7   :  { %1431 = dma.done.wait [#allocation3], 128  }
 0x5e8   :  { %1432 = vsyncadd [#allocation3], 4294967168 }
 0x5e9   :  { %1080 = vsyncpa [#allocation3], 1 }

</bundles_post_ra>
